<compile_context>
chip_gen: v7x
topology: tpu7x:2x2x1
jax: 0.10.0
libtpu: 0.0.40
codegen_flags: <defaults>
</compile_context>

<pallas_src>
import functools

import jax
import jax.numpy as jnp
import numpy as np
from jax import lax
from jax.experimental import pallas as pl
from jax.experimental.pallas import tpu as pltpu


# ----------------------------------------------------------------------------
# Kernels
# ----------------------------------------------------------------------------
def _bbd_kernel_up(x_ref, *refs, seg_len, stride):
    """stride != 1: nearest-upsample folded into conv1 / shortcut (phase trick).

    All compute happens at the *input* resolution; output phase p holds
    y[..., stride*i + p].
    """
    if stride > 2:
        w1e0_ref, w1e1_ref, w1mid_ref, w2_ref, wsc_ref, sb_ref, o_ref = refs
    else:
        w1e0_ref, w1e1_ref, w2_ref, wsc_ref, sb_ref, o_ref = refs
        w1mid_ref = None

    x = x_ref[...]
    n_lanes = x.shape[1]
    md = w2_ref.dtype
    prec = lax.Precision.HIGHEST if md == jnp.float32 else None

    # Per-sample segment-boundary masks (hoisted; shared by both convs).
    pos = lax.broadcasted_iota(jnp.int32, (1, n_lanes), 1) % seg_len
    m_first = pos > 0                 # has a valid left neighbour in its segment
    m_last = pos < seg_len - 1        # has a valid right neighbour in its segment

    def prev_of(v):                   # v[:, i-1], zero at segment start (XLU roll)
        return jnp.where(m_first, pltpu.roll(v, 1, axis=1), 0.0)

    def next_of(v):                   # v[:, i+1], zero at segment end
        return jnp.where(m_last, pltpu.roll(v, n_lanes - 1, axis=1), 0.0)

    def dot(w_ref, a):                # MXU matmul, f32 accumulation
        return jnp.dot(w_ref[...], a.astype(md),
                       preferred_element_type=jnp.float32, precision=prec)

    s1, b1 = sb_ref[:, 0:1], sb_ref[:, 1:2]
    s2, b2 = sb_ref[:, 2:3], sb_ref[:, 3:4]
    ssc, bsc = sb_ref[:, 4:5], sb_ref[:, 5:6]

    def bn1_relu(v):
        return jnp.maximum(v * s1 + b1, 0.0)

    # --- conv1 (k=3, pad=1) on the nearest-upsampled signal, per output phase:
    #   phase 0        : W1[0] @ x[i-1] + (W1[1]+W1[2]) @ x[i]
    #   middle phases  : (W1[0]+W1[1]+W1[2]) @ x[i]
    #   phase stride-1 : (W1[0]+W1[1]) @ x[i] + W1[2] @ x[i+1]
    h = [None] * stride
    h[0] = bn1_relu(dot(w1e0_ref, jnp.concatenate([prev_of(x), x], axis=0)))
    h[stride - 1] = bn1_relu(dot(w1e1_ref, jnp.concatenate([x, next_of(x)], axis=0)))
    if stride > 2:
        h_mid = bn1_relu(dot(w1mid_ref, x))
        for p in range(1, stride - 1):
            h[p] = h_mid

    # --- shortcut: 1x1 conv + bn on the upsampled input (identical for all phases,
    #     so it runs once on the half-rate lanes, not on xu).
    sc = dot(wsc_ref, x) * ssc + bsc

    # --- conv2 (k=3, pad=1) at the upsampled resolution, in the phase domain.
    for p in range(stride):
        prv = h[p - 1] if p >= 1 else prev_of(h[stride - 1])
        nxt = h[p + 1] if p <= stride - 2 else next_of(h[0])
        out_p = dot(w2_ref, jnp.concatenate([prv, h[p], nxt], axis=0)) * s2 + b2
        o_ref[p] = jnp.maximum(out_p + sc, 0.0).astype(o_ref.dtype)


def _bbd_kernel_id(x_ref, w1_ref, w2_ref, sb_ref, o_ref, *, seg_len):
    """stride == 1: pre = Identity, shortcut = Identity (no extra matmuls)."""
    x = x_ref[...]
    n_lanes = x.shape[1]
    md = w1_ref.dtype
    prec = lax.Precision.HIGHEST if md == jnp.float32 else None

    pos = lax.broadcasted_iota(jnp.int32, (1, n_lanes), 1) % seg_len
    m_first = pos > 0
    m_last = pos < seg_len - 1

    def taps3(v):   # [v[:, i-1]; v[:, i]; v[:, i+1]] with per-segment zero pad
        vm1 = jnp.where(m_first, pltpu.roll(v, 1, axis=1), 0.0)
        vp1 = jnp.where(m_last, pltpu.roll(v, n_lanes - 1, axis=1), 0.0)
        return jnp.concatenate([vm1, v, vp1], axis=0)

    def dot(w_ref, a):
        return jnp.dot(w_ref[...], a.astype(md),
                       preferred_element_type=jnp.float32, precision=prec)

    s1, b1 = sb_ref[:, 0:1], sb_ref[:, 1:2]
    s2, b2 = sb_ref[:, 2:3], sb_ref[:, 3:4]

    h = jnp.maximum(dot(w1_ref, taps3(x)) * s1 + b1, 0.0)
    out = dot(w2_ref, taps3(h)) * s2 + b2
    o_ref[...] = jnp.maximum(out + x, 0.0).astype(o_ref.dtype)


# ----------------------------------------------------------------------------
# Block-size / VMEM heuristics
# ----------------------------------------------------------------------------
def _vmem_budget_and_limit():
    """Generation-aware VMEM budget (v5e/v6e: 128 MiB, v7x: 64 MiB per core)."""
    try:
        cap = int(pltpu.get_tpu_info().vmem_capacity_bytes)
    except Exception:                      # unknown -> assume the smallest (v7x)
        cap = 64 * 1024 * 1024
    budget = min(cap // 4, 24 * 1024 * 1024)   # for picking block sizes
    limit = min(cap // 2, 64 * 1024 * 1024)    # scoped VMEM handed to Mosaic
    return budget, limit


def _pick_group_size(n, l_in, c_in, c_out, stride, vmem_budget_bytes,
                     target_lanes=2048, min_split_lanes=512):
    """Pick how many batch elements are packed per grid step.

    Largest nb (divisor of n) whose lane width nb*l_in is a multiple of 128
    (or the full batch), fits the VMEM budget, and stays <= target_lanes
    (512-2048-lane blocks reach ~85% of HBM BW vs ~29% at 128).  Prefers
    >= 2 grid steps when blocks stay >= min_split_lanes so the 'parallel'
    grid axis can be sharded across v7x's two TensorCores.
    """
    def est_bytes(nb):
        lanes = nb * l_in
        blocks = 2 * c_in * lanes + 2 * stride * c_out * lanes   # double-buffered I/O
        live = (3 * c_in + (stride + 4) * c_out) * lanes         # taps + phases (rough)
        return 4 * (blocks + live)

    legal = [nb for nb in range(1, n + 1)
             if n % nb == 0 and ((nb * l_in) % 128 == 0 or nb == n)]
    fitting = [nb for nb in legal if est_bytes(nb) <= vmem_budget_bytes]
    if not fitting:
        # TODO(synk): tile the lane axis with a 1-column halo instead of
        # falling back to the smallest legal block.
        fitting = legal[:1]
    under = [nb for nb in fitting if nb * l_in <= target_lanes]
    nb = max(under) if under else min(fitting)
    if n // nb == 1:             # try to expose >= 2 grid steps (v7x megacore)
        split = [c for c in fitting if n // c >= 2 and c * l_in >= min_split_lanes]
        if split:
            nb = max(split)
    return nb, n // nb


# ----------------------------------------------------------------------------
# Host wrapper
# ----------------------------------------------------------------------------
def basic_block_dec(x, params, stride, *, matmul_dtype=jnp.float32):
    """x: (N, C_in, L) f32 -> (N, C_out, L*stride) f32, C_out = C_in // stride.

    matmul_dtype=jnp.bfloat16 casts the MXU operands (weights in the wrapper,
    activations at the dot boundary) for the bf16-native v6e/v7x MXU; the
    accumulation and the BN/ReLU math stay f32.
    """
    n, c_in, l_in = x.shape
    c_out = c_in // stride
    (w1, s1, b1, w2, s2, b2, wsc, ssc, bsc) = params
    md = matmul_dtype

    # Pack the batch onto the lane axis: (N, C, L) -> (C, N*L).
    # TODO(synk): for a full decoder stack keep activations in this packed
    # layout across blocks so the pack/unpack HBM transposes are paid once.
    xp = jnp.transpose(x, (1, 0, 2)).reshape(c_in, n * l_in)

    # conv2 taps folded into one (c_out, 3*c_out) matrix, [tap0 | tap1 | tap2].
    w2cat = jnp.transpose(w2, (0, 2, 1)).reshape(c_out, 3 * c_out).astype(md)

    budget, vmem_limit = _vmem_budget_and_limit()
    nb, num_groups = _pick_group_size(n, l_in, c_in, c_out, stride, budget)
    lanes = nb * l_in

    def full(a):
        nd = a.ndim
        return pl.BlockSpec(a.shape, lambda *_: (0,) * nd)

    x_spec = pl.BlockSpec((c_in, lanes), lambda g: (0, g))

    if stride != 1:
        t0, t1, t2 = w1[:, :, 0], w1[:, :, 1], w1[:, :, 2]
        # Nearest-upsample folded into conv1 (per output phase) and the shortcut.
        w1e0 = jnp.concatenate([t0, t1 + t2], axis=1).astype(md)     # phase 0
        w1e1 = jnp.concatenate([t0 + t1, t2], axis=1).astype(md)     # phase stride-1
        sb = jnp.concatenate([s1, b1, s2, b2, ssc, bsc], axis=1).astype(jnp.float32)
        inputs = [xp, w1e0, w1e1]
        if stride > 2:
            inputs.append((t0 + t1 + t2).astype(md))                 # middle phases
        inputs += [w2cat, wsc.astype(md), sb]
        kernel = functools.partial(_bbd_kernel_up, seg_len=l_in, stride=stride)
        out_shape = jax.ShapeDtypeStruct((stride, c_out, n * l_in), jnp.float32)
        out_spec = pl.BlockSpec((stride, c_out, lanes), lambda g: (0, 0, g))
    else:
        w1cat = jnp.transpose(w1, (0, 2, 1)).reshape(c_out, 3 * c_in).astype(md)
        sb = jnp.concatenate([s1, b1, s2, b2], axis=1).astype(jnp.float32)
        inputs = [xp, w1cat, w2cat, sb]
        kernel = functools.partial(_bbd_kernel_id, seg_len=l_in)
        out_shape = jax.ShapeDtypeStruct((c_out, n * l_in), jnp.float32)
        out_spec = pl.BlockSpec((c_out, lanes), lambda g: (0, g))

    in_specs = [x_spec] + [full(a) for a in inputs[1:]]

    y = pl.pallas_call(
        kernel,
        out_shape=out_shape,
        grid_spec=pltpu.PrefetchScalarGridSpec(
            num_scalar_prefetch=0,
            grid=(num_groups,),
            in_specs=in_specs,
            out_specs=out_spec,
        ),
        compiler_params=pltpu.CompilerParams(
            dimension_semantics=("parallel",),
            vmem_limit_bytes=vmem_limit),
    )(*inputs)

    if stride != 1:
        # Interleave the phases: (p, c, b, i) -> (b, c, i, p) -> (b, c, L*stride).
        y = y.reshape(stride, c_out, n, l_in)
        y = jnp.transpose(y, (2, 1, 3, 0)).reshape(n, c_out, l_in * stride)
    else:
        y = jnp.transpose(y.reshape(c_out, n, l_in), (1, 0, 2))
    return y


# ----------------------------------------------------------------------------
# Parameters (PyTorch layouts, eval-mode BN folded) and pure-JAX reference
# ----------------------------------------------------------------------------
def fold_bn(gamma, beta, mean, var, eps=1e-5):
    scale = gamma / jnp.sqrt(var + eps)
    bias = beta - mean * scale
    return scale[:, None].astype(jnp.float32), bias[:, None].astype(jnp.float32)


def make_params(key, in_planes, stride):
    out_planes = in_planes // stride
    ks = jax.random.split(key, 12)

    def rnd(k, shape, scale=0.1):
        return (scale * jax.random.normal(k, shape)).astype(jnp.float32)

    w1 = rnd(ks[0], (out_planes, in_planes, 3))     # Conv1d layout (O, I, K)
    w2 = rnd(ks[1], (out_planes, out_planes, 3))

    def bn(k0, k1, k2, k3, c):
        gamma = 1.0 + 0.1 * jax.random.normal(k0, (c,))
        beta = 0.1 * jax.random.normal(k1, (c,))
        mean = 0.1 * jax.random.normal(k2, (c,))
        var = jnp.abs(1.0 + 0.1 * jax.random.normal(k3, (c,)))
        return fold_bn(gamma, beta, mean, var)

    s1, b1 = bn(ks[2], ks[3], ks[4], ks[5], out_planes)
    s2, b2 = bn(ks[6], ks[7], ks[8], ks[9], out_planes)

    if stride != 1:
        wsc = rnd(ks[10], (out_planes, in_planes, 1))[:, :, 0]   # (O, I)
        g = 1.0 + 0.05 * jax.random.normal(ks[11], (out_planes,))
        ssc, bsc = fold_bn(g, jnp.zeros(out_planes), jnp.zeros(out_planes),
                           jnp.ones(out_planes))
    else:
        wsc = ssc = bsc = None                      # shortcut == Identity
    return (w1, s1, b1, w2, s2, b2, wsc, ssc, bsc)


def reference(x, params, stride):
    """Pure-JAX reference of the PyTorch forward (eval-mode BN)."""
    (w1, s1, b1, w2, s2, b2, wsc, ssc, bsc) = params
    x_up = jnp.repeat(x, stride, axis=-1) if stride != 1 else x

    def conv1d(inp, w, pad):
        return lax.conv_general_dilated(
            inp, w, window_strides=(1,), padding=[(pad, pad)],
            dimension_numbers=("NCH", "OIH", "NCH"),
            precision=lax.Precision.HIGHEST)

    out = conv1d(x_up, w1, 1) * s1[None] + b1[None]
    out = jnp.maximum(out, 0.0)
    out = conv1d(out, w2, 1) * s2[None] + b2[None]
    if stride != 1:
        sc = jnp.einsum("oc,ncl->nol", wsc, x_up,
                        precision=lax.Precision.HIGHEST) * ssc[None] + bsc[None]
    else:
        sc = x_up
    return jnp.maximum(out + sc, 0.0)


if __name__ == "__main__":
    key = jax.random.PRNGKey(0)
    k1, k2, k3, k4 = jax.random.split(key, 4)

    # stride=2 block: nearest-upsample x2 folded into conv1/shortcut (no r-matrix).
    n, in_planes, L, stride = 4, 16, 16, 2
    x = jax.random.normal(k1, (n, in_planes, L), dtype=jnp.float32)
    params = make_params(k2, in_planes, stride)
    y_ref = reference(x, params, stride)

    y = jax.block_until_ready(basic_block_dec(x, params, stride))
    np.testing.assert_allclose(np.asarray(y), np.asarray(y_ref),
                               rtol=1e-4, atol=1e-4)

    # Same block with bf16 matmul operands (v6e/v7x MXU path); loose tolerance.
    y_bf16 = jax.block_until_ready(
        basic_block_dec(x, params, stride, matmul_dtype=jnp.bfloat16))
    np.testing.assert_allclose(np.asarray(y_bf16), np.asarray(y_ref),
                               rtol=1e-1, atol=1e-1)

    # stride=1 block: identity pre / identity shortcut (specialized kernel path).
    n1, in1, L1, stride1 = 4, 16, 32, 1
    x1 = jax.random.normal(k3, (n1, in1, L1), dtype=jnp.float32)
    params1 = make_params(k4, in1, stride1)
    y1 = jax.block_until_ready(basic_block_dec(x1, params1, stride1))
    np.testing.assert_allclose(np.asarray(y1),
                               np.asarray(reference(x1, params1, stride1)),
                               rtol=1e-4, atol=1e-4)

    print("KERNEL_OK")
</pallas_src>

<mosaic_0001>
module attributes {stable_mosaic.version = 11 : i64} {
  func.func @_bbd_kernel_up(%arg0: i32, %arg1: memref<16x64xf32, #tpu.memory_space<vmem>>, %arg2: memref<8x32xf32, #tpu.memory_space<vmem>>, %arg3: memref<8x32xf32, #tpu.memory_space<vmem>>, %arg4: memref<8x24xf32, #tpu.memory_space<vmem>>, %arg5: memref<8x16xf32, #tpu.memory_space<vmem>>, %arg6: memref<8x6xf32, #tpu.memory_space<vmem>>, %arg7: memref<2x8x64xf32, #tpu.memory_space<vmem>>) attributes {dimension_semantics = [#tpu.dimension_semantics<parallel>], iteration_bounds = array<i64: 1>, scalar_prefetch = 0 : i64, scratch_operands = 0 : i64, tpu.core_type = #tpu.core_type<tc>, window_params = [{transform_indices = @transform_0, window_bounds = array<i64: 16, 64>}, {pipeline_mode = #tpu.pipeline_mode<synchronous>, transform_indices = @transform_1, window_bounds = array<i64: 8, 32>}, {pipeline_mode = #tpu.pipeline_mode<synchronous>, transform_indices = @transform_2, window_bounds = array<i64: 8, 32>}, {pipeline_mode = #tpu.pipeline_mode<synchronous>, transform_indices = @transform_3, window_bounds = array<i64: 8, 24>}, {pipeline_mode = #tpu.pipeline_mode<synchronous>, transform_indices = @transform_4, window_bounds = array<i64: 8, 16>}, {pipeline_mode = #tpu.pipeline_mode<synchronous>, transform_indices = @transform_5, window_bounds = array<i64: 8, 6>}, {transform_indices = @transform_6, window_bounds = array<i64: 2, 8, 64>}]} {
    %c0 = arith.constant 0 : index
    %c0_0 = arith.constant 0 : index
    %0 = vector.load %arg1[%c0, %c0_0] : memref<16x64xf32, #tpu.memory_space<vmem>>, vector<16x64xf32>
    %1 = tpu.iota {dimensions = array<i32: 1>} : vector<1x64xi32>
    %c16_i32 = arith.constant 16 : i32
    %c0_i32 = arith.constant 0 : i32
    %2 = arith.cmpi eq, %c16_i32, %c0_i32 : i32
    %c1_i32 = arith.constant 1 : i32
    %3 = arith.select %2, %c1_i32, %c16_i32 : i32
    %4 = vector.broadcast %3 : i32 to vector<1x64xi32>
    %5 = arith.remsi %1, %4 : vector<1x64xi32>
    %c0_i32_1 = arith.constant 0 : i32
    %6 = vector.broadcast %c0_i32_1 : i32 to vector<1x64xi32>
    %7 = arith.cmpi ne, %5, %6 : vector<1x64xi32>
    %c0_i32_2 = arith.constant 0 : i32
    %8 = vector.broadcast %c0_i32_2 : i32 to vector<1x64xi32>
    %9 = arith.cmpi slt, %5, %8 : vector<1x64xi32>
    %c0_i32_3 = arith.constant 0 : i32
    %10 = arith.cmpi slt, %3, %c0_i32_3 : i32
    %11 = vector.broadcast %10 : i1 to vector<1x64xi1>
    %12 = vector.broadcast %11 : vector<1x64xi1> to vector<1x64xi1>
    %13 = arith.xori %9, %12 : vector<1x64xi1>
    %14 = arith.andi %13, %7 : vector<1x64xi1>
    %15 = vector.broadcast %3 : i32 to vector<1x64xi32>
    %16 = arith.addi %5, %15 : vector<1x64xi32>
    %17 = arith.select %14, %16, %5 : vector<1x64xi1>, vector<1x64xi32>
    %c0_i32_4 = arith.constant 0 : i32
    %18 = vector.broadcast %c0_i32_4 : i32 to vector<1x64xi32>
    %19 = arith.cmpi sgt, %17, %18 : vector<1x64xi32>
    %c15_i32 = arith.constant 15 : i32
    %20 = vector.broadcast %c15_i32 : i32 to vector<1x64xi32>
    %21 = arith.cmpi slt, %17, %20 : vector<1x64xi32>
    %c0_5 = arith.constant 0 : index
    %c0_6 = arith.constant 0 : index
    %22 = vector.load %arg6[%c0_5, %c0_6] : memref<8x6xf32, #tpu.memory_space<vmem>>, vector<8x1xf32>
    %c0_7 = arith.constant 0 : index
    %c1 = arith.constant 1 : index
    %23 = vector.load %arg6[%c0_7, %c1] : memref<8x6xf32, #tpu.memory_space<vmem>>, vector<8x1xf32>
    %c0_8 = arith.constant 0 : index
    %c2 = arith.constant 2 : index
    %24 = vector.load %arg6[%c0_8, %c2] : memref<8x6xf32, #tpu.memory_space<vmem>>, vector<8x1xf32>
    %c0_9 = arith.constant 0 : index
    %c3 = arith.constant 3 : index
    %25 = vector.load %arg6[%c0_9, %c3] : memref<8x6xf32, #tpu.memory_space<vmem>>, vector<8x1xf32>
    %c0_10 = arith.constant 0 : index
    %c4 = arith.constant 4 : index
    %26 = vector.load %arg6[%c0_10, %c4] : memref<8x6xf32, #tpu.memory_space<vmem>>, vector<8x1xf32>
    %c0_11 = arith.constant 0 : index
    %c5 = arith.constant 5 : index
    %27 = vector.load %arg6[%c0_11, %c5] : memref<8x6xf32, #tpu.memory_space<vmem>>, vector<8x1xf32>
    %c1_i32_12 = arith.constant 1 : i32
    %28 = tpu.dynamic_rotate %0 by %c1_i32_12 dim 1 : vector<16x64xf32>, i32 -> vector<16x64xf32>
    %cst = arith.constant 0.000000e+00 : f32
    %29 = vector.shape_cast %19 : vector<1x64xi1> to vector<1x64xi1>
    %30 = vector.broadcast %29 : vector<1x64xi1> to vector<16x64xi1>
    %31 = vector.broadcast %cst : f32 to vector<16x64xf32>
    %32 = arith.select %30, %28, %31 : vector<16x64xi1>, vector<16x64xf32>
    %33 = tpu.concatenate %32, %0 in 0 : vector<16x64xf32>, vector<16x64xf32> -> vector<32x64xf32>
    %c0_13 = arith.constant 0 : index
    %c0_14 = arith.constant 0 : index
    %34 = vector.load %arg2[%c0_13, %c0_14] : memref<8x32xf32, #tpu.memory_space<vmem>>, vector<8x32xf32>
    %cst_15 = arith.constant dense<0.000000e+00> : vector<8x64xf32>
    %35 = tpu.matmul %34, %33, %cst_15 {dimension_numbers = #tpu.dot_dimension_numbers<[1], [0], [0], [1], [0, 0, 1, 1], [], []>, precision = #tpu.contract_precision<fp32>} : vector<8x32xf32>, vector<32x64xf32>, vector<8x64xf32> -> vector<8x64xf32>
    %36 = vector.broadcast %22 : vector<8x1xf32> to vector<8x64xf32>
    %37 = arith.mulf %35, %36 : vector<8x64xf32>
    %38 = vector.broadcast %23 : vector<8x1xf32> to vector<8x64xf32>
    %39 = arith.addf %37, %38 : vector<8x64xf32>
    %cst_16 = arith.constant 0.000000e+00 : f32
    %40 = vector.broadcast %cst_16 : f32 to vector<8x64xf32>
    %41 = arith.maximumf %39, %40 : vector<8x64xf32>
    %c63_i32 = arith.constant 63 : i32
    %42 = tpu.dynamic_rotate %0 by %c63_i32 dim 1 : vector<16x64xf32>, i32 -> vector<16x64xf32>
    %cst_17 = arith.constant 0.000000e+00 : f32
    %43 = vector.shape_cast %21 : vector<1x64xi1> to vector<1x64xi1>
    %44 = vector.broadcast %43 : vector<1x64xi1> to vector<16x64xi1>
    %45 = vector.broadcast %cst_17 : f32 to vector<16x64xf32>
    %46 = arith.select %44, %42, %45 : vector<16x64xi1>, vector<16x64xf32>
    %47 = tpu.concatenate %0, %46 in 0 : vector<16x64xf32>, vector<16x64xf32> -> vector<32x64xf32>
    %c0_18 = arith.constant 0 : index
    %c0_19 = arith.constant 0 : index
    %48 = vector.load %arg3[%c0_18, %c0_19] : memref<8x32xf32, #tpu.memory_space<vmem>>, vector<8x32xf32>
    %cst_20 = arith.constant dense<0.000000e+00> : vector<8x64xf32>
    %49 = tpu.matmul %48, %47, %cst_20 {dimension_numbers = #tpu.dot_dimension_numbers<[1], [0], [0], [1], [0, 0, 1, 1], [], []>, precision = #tpu.contract_precision<fp32>} : vector<8x32xf32>, vector<32x64xf32>, vector<8x64xf32> -> vector<8x64xf32>
    %50 = vector.broadcast %22 : vector<8x1xf32> to vector<8x64xf32>
    %51 = arith.mulf %49, %50 : vector<8x64xf32>
    %52 = vector.broadcast %23 : vector<8x1xf32> to vector<8x64xf32>
    %53 = arith.addf %51, %52 : vector<8x64xf32>
    %cst_21 = arith.constant 0.000000e+00 : f32
    %54 = vector.broadcast %cst_21 : f32 to vector<8x64xf32>
    %55 = arith.maximumf %53, %54 : vector<8x64xf32>
    %c0_22 = arith.constant 0 : index
    %c0_23 = arith.constant 0 : index
    %56 = vector.load %arg5[%c0_22, %c0_23] : memref<8x16xf32, #tpu.memory_space<vmem>>, vector<8x16xf32>
    %cst_24 = arith.constant dense<0.000000e+00> : vector<8x64xf32>
    %57 = tpu.matmul %56, %0, %cst_24 {dimension_numbers = #tpu.dot_dimension_numbers<[1], [0], [0], [1], [0, 0, 1, 1], [], []>, precision = #tpu.contract_precision<fp32>} : vector<8x16xf32>, vector<16x64xf32>, vector<8x64xf32> -> vector<8x64xf32>
    %58 = vector.broadcast %26 : vector<8x1xf32> to vector<8x64xf32>
    %59 = arith.mulf %57, %58 : vector<8x64xf32>
    %60 = vector.broadcast %27 : vector<8x1xf32> to vector<8x64xf32>
    %61 = arith.addf %59, %60 : vector<8x64xf32>
    %c1_i32_25 = arith.constant 1 : i32
    %62 = tpu.dynamic_rotate %55 by %c1_i32_25 dim 1 : vector<8x64xf32>, i32 -> vector<8x64xf32>
    %cst_26 = arith.constant 0.000000e+00 : f32
    %63 = vector.shape_cast %19 : vector<1x64xi1> to vector<1x64xi1>
    %64 = vector.broadcast %63 : vector<1x64xi1> to vector<8x64xi1>
    %65 = vector.broadcast %cst_26 : f32 to vector<8x64xf32>
    %66 = arith.select %64, %62, %65 : vector<8x64xi1>, vector<8x64xf32>
    %67 = tpu.concatenate %66, %41, %55 in 0 : vector<8x64xf32>, vector<8x64xf32>, vector<8x64xf32> -> vector<24x64xf32>
    %c0_27 = arith.constant 0 : index
    %c0_28 = arith.constant 0 : index
    %68 = vector.load %arg4[%c0_27, %c0_28] : memref<8x24xf32, #tpu.memory_space<vmem>>, vector<8x24xf32>
    %cst_29 = arith.constant dense<0.000000e+00> : vector<8x64xf32>
    %69 = tpu.matmul %68, %67, %cst_29 {dimension_numbers = #tpu.dot_dimension_numbers<[1], [0], [0], [1], [0, 0, 1, 1], [], []>, precision = #tpu.contract_precision<fp32>} : vector<8x24xf32>, vector<24x64xf32>, vector<8x64xf32> -> vector<8x64xf32>
    %70 = vector.broadcast %24 : vector<8x1xf32> to vector<8x64xf32>
    %71 = arith.mulf %69, %70 : vector<8x64xf32>
    %72 = vector.broadcast %25 : vector<8x1xf32> to vector<8x64xf32>
    %73 = arith.addf %71, %72 : vector<8x64xf32>
    %74 = arith.addf %73, %61 : vector<8x64xf32>
    %cst_30 = arith.constant 0.000000e+00 : f32
    %75 = vector.broadcast %cst_30 : f32 to vector<8x64xf32>
    %76 = arith.maximumf %74, %75 : vector<8x64xf32>
    %c0_31 = arith.constant 0 : index
    %c0_32 = arith.constant 0 : index
    %c0_33 = arith.constant 0 : index
    %77 = vector.load %arg7[%c0_31, %c0_32, %c0_33] : memref<2x8x64xf32, #tpu.memory_space<vmem>>, vector<1x8x64xf32>
    %78 = vector.shape_cast %77 : vector<1x8x64xf32> to vector<8x64xf32>
    %79 = vector.shape_cast %76 : vector<8x64xf32> to vector<1x8x64xf32>
    tpu.vector_store %arg7[%c0_31, %c0_32, %c0_33], %79 {strides = array<i32>} : memref<2x8x64xf32, #tpu.memory_space<vmem>>, vector<1x8x64xf32>,
    %c63_i32_34 = arith.constant 63 : i32
    %80 = tpu.dynamic_rotate %41 by %c63_i32_34 dim 1 : vector<8x64xf32>, i32 -> vector<8x64xf32>
    %cst_35 = arith.constant 0.000000e+00 : f32
    %81 = vector.shape_cast %21 : vector<1x64xi1> to vector<1x64xi1>
    %82 = vector.broadcast %81 : vector<1x64xi1> to vector<8x64xi1>
    %83 = vector.broadcast %cst_35 : f32 to vector<8x64xf32>
    %84 = arith.select %82, %80, %83 : vector<8x64xi1>, vector<8x64xf32>
    %85 = tpu.concatenate %41, %55, %84 in 0 : vector<8x64xf32>, vector<8x64xf32>, vector<8x64xf32> -> vector<24x64xf32>
    %c0_36 = arith.constant 0 : index
    %c0_37 = arith.constant 0 : index
    %86 = vector.load %arg4[%c0_36, %c0_37] : memref<8x24xf32, #tpu.memory_space<vmem>>, vector<8x24xf32>
    %cst_38 = arith.constant dense<0.000000e+00> : vector<8x64xf32>
    %87 = tpu.matmul %86, %85, %cst_38 {dimension_numbers = #tpu.dot_dimension_numbers<[1], [0], [0], [1], [0, 0, 1, 1], [], []>, precision = #tpu.contract_precision<fp32>} : vector<8x24xf32>, vector<24x64xf32>, vector<8x64xf32> -> vector<8x64xf32>
    %88 = vector.broadcast %24 : vector<8x1xf32> to vector<8x64xf32>
    %89 = arith.mulf %87, %88 : vector<8x64xf32>
    %90 = vector.broadcast %25 : vector<8x1xf32> to vector<8x64xf32>
    %91 = arith.addf %89, %90 : vector<8x64xf32>
    %92 = arith.addf %91, %61 : vector<8x64xf32>
    %cst_39 = arith.constant 0.000000e+00 : f32
    %93 = vector.broadcast %cst_39 : f32 to vector<8x64xf32>
    %94 = arith.maximumf %92, %93 : vector<8x64xf32>
    %c1_40 = arith.constant 1 : index
    %c0_41 = arith.constant 0 : index
    %c0_42 = arith.constant 0 : index
    %95 = vector.load %arg7[%c1_40, %c0_41, %c0_42] : memref<2x8x64xf32, #tpu.memory_space<vmem>>, vector<1x8x64xf32>
    %96 = vector.shape_cast %95 : vector<1x8x64xf32> to vector<8x64xf32>
    %97 = vector.shape_cast %94 : vector<8x64xf32> to vector<1x8x64xf32>
    tpu.vector_store %arg7[%c1_40, %c0_41, %c0_42], %97 {strides = array<i32>} : memref<2x8x64xf32, #tpu.memory_space<vmem>>, vector<1x8x64xf32>,
    return
  }
  func.func @transform_0(%arg0: i32) -> (i32, i32) {
    %c0_i32 = arith.constant 0 : i32
    %c0_i32_0 = arith.constant 0 : i32
    return %c0_i32, %arg0 : i32, i32
  }
  func.func @transform_1(%arg0: i32) -> (i32, i32) {
    %c0_i32 = arith.constant 0 : i32
    %c0_i32_0 = arith.constant 0 : i32
    %c0_i32_1 = arith.constant 0 : i32
    return %c0_i32, %c0_i32_0 : i32, i32
  }
  func.func @transform_2(%arg0: i32) -> (i32, i32) {
    %c0_i32 = arith.constant 0 : i32
    %c0_i32_0 = arith.constant 0 : i32
    %c0_i32_1 = arith.constant 0 : i32
    return %c0_i32, %c0_i32_0 : i32, i32
  }
  func.func @transform_3(%arg0: i32) -> (i32, i32) {
    %c0_i32 = arith.constant 0 : i32
    %c0_i32_0 = arith.constant 0 : i32
    %c0_i32_1 = arith.constant 0 : i32
    return %c0_i32, %c0_i32_0 : i32, i32
  }
  func.func @transform_4(%arg0: i32) -> (i32, i32) {
    %c0_i32 = arith.constant 0 : i32
    %c0_i32_0 = arith.constant 0 : i32
    %c0_i32_1 = arith.constant 0 : i32
    return %c0_i32, %c0_i32_0 : i32, i32
  }
  func.func @transform_5(%arg0: i32) -> (i32, i32) {
    %c0_i32 = arith.constant 0 : i32
    %c0_i32_0 = arith.constant 0 : i32
    %c0_i32_1 = arith.constant 0 : i32
    return %c0_i32, %c0_i32_0 : i32, i32
  }
  func.func @transform_6(%arg0: i32) -> (i32, i32, i32) {
    %c0_i32 = arith.constant 0 : i32
    %c0_i32_0 = arith.constant 0 : i32
    %c0_i32_1 = arith.constant 0 : i32
    return %c0_i32, %c0_i32_0, %arg0 : i32, i32, i32
  }
}

</mosaic_0001>

<bundles_post_ra>
// kernel: tpu_custom_call.1
= control target key start
LH: loop header
LB: loop body
LE: loop exit
PB: predicated region body
PF: predicated region fallthrough
CT: control target
= control target key end

     0   :  { %11 = vsyncpa [#allocation3], 0  ;;  %s3828_s0 = inlined_call_operand.hbm [shape: f32[16,64], index: 0, kind: input, shape index: {}]   ;;  %s3829_s1 = inlined_call_operand.hbm [shape: f32[8,32], index: 1, kind: input, shape index: {}]   ;;  %s3830_s2 = inlined_call_operand.hbm [shape: f32[8,32], index: 2, kind: input, shape index: {}]   ;;  %s3831_s3 = inlined_call_operand.vmem [shape: f32[8,24], index: 3, kind: input, shape index: {}]   ;;  %s3832_s4 = inlined_call_operand.hbm [shape: f32[8,16], index: 4, kind: input, shape index: {}]   ;;  %s3833_s5 = inlined_call_operand.vmem [shape: f32[8,6], index: 5, kind: input, shape index: {}]   ;;  %s3834_s6 = inlined_call_operand.hbm [shape: f32[2,8,64], index: 6, kind: output, shape index: {}]  }
   0x1   :  { %12 = vsyncpa [#allocation6], 0 }
   0x2   :  { %13 = vsyncpa [#allocation9], 0 }
   0x3   :  { %14 = vsyncpa [#allocation4], 0  ;;  %s3335_s21 = smov [#allocation5]   ;;  %s3336_s23 = smov [#allocation2]  }
   0x4   :  { %s33_s22 = sshll.u32 %s3335_s21, 4  ;;  %s20_s24 = sshll.u32 %s3336_s23, 4  ;;  %s34_s22 = int_to_ptr.vmem [resolvable:$true] %s33_s22  ;;  %s3389_s24 = int_to_ptr.vmem [resolvable:$true] %s20_s24 }
   0x5   :  { %s3217_s27 = scalar_lea.hbm %s3829_s1, 128 }
   0x6   :  { %p3218_p0 = scmp.ne.s32.totalorder %s3829_s1, %s3217_s27  ;;  %p3221_p1 = scmp.lt.u32.totalorder %s3217_s27, %s3829_s1 }
   0x8   :  { %p3223_p2 = pnand %p3221_p1, %p3218_p0 }
   0xa   :  { %3226 = shalt.err (!%p3223_p2)
}
   0xb   :  { %s3227_s8 = scalar_lea.vmem %s34_s22, 128  ;;  %p3232_p4 = scmp.lt.s32.totalorder %s34_s22, %s34_s22 }
   0xc   :  { %p3228_p3 = scmp.ne.s32.totalorder %s34_s22, %s3227_s8  ;;  %p3233_p5 = scmp.lt.s32.totalorder %s3227_s8, %s3227_s8 }
   0xe   :  { %p3234_p6 = por %p3233_p5, %p3232_p4 }
  0x10   :  { %p3235_p7 = pnand %p3234_p6, %p3228_p3 }
  0x12   :  { %3238 = shalt.err (!%p3235_p7)
}
  0x13   :  { %36 = dma.hbm_to_vmem [thread:$0]  %s3829_s1, 128, %s34_s22, [#allocation6]  }
  0x14   :  { %s3239_s13 = scalar_lea.hbm %s3828_s0, 256 }
  0x15   :  { %p3240_p8 = scmp.ne.s32.totalorder %s3828_s0, %s3239_s13  ;;  %p3243_p9 = scmp.lt.u32.totalorder %s3239_s13, %s3828_s0 }
  0x17   :  { %p3245_p10 = pnand %p3243_p9, %p3240_p8 }
  0x19   :  { %3248 = shalt.err (!%p3245_p10)
}
  0x1a   :  { %s3249_s18 = scalar_lea.vmem %s3389_s24, 256  ;;  %p3254_p12 = scmp.lt.s32.totalorder %s3389_s24, %s3389_s24 }
  0x1b   :  { %p3250_p11 = scmp.ne.s32.totalorder %s3389_s24, %s3249_s18  ;;  %p3255_p13 = scmp.lt.s32.totalorder %s3249_s18, %s3249_s18 }
  0x1d   :  { %p3256_p0 = por %p3255_p13, %p3254_p12 }
  0x1f   :  { %p3257_p1 = pnand %p3256_p0, %p3250_p11 }
  0x21   :  { %3260 = shalt.err (!%p3257_p1)
}
  0x22   :  { %s3337_s1 = smov 128   ;;  %s3338_s19 = smov 8  }
  0x23   :  { %26 = dma.hbm_to_vmem [thread:$0]  %s3828_s0, 256, %s3389_s24, [#allocation3], %s3337_s1, %s3337_s1, %s3338_s19  }
  0x24   :  { %s3339_s22 = smov [#allocation7]   ;;  %s3340_s25 = smov [#allocation8]  }
  0x25   :  { %s43_s23 = sshll.u32 %s3339_s22, 4  ;;  %s55_s26 = sshll.u32 %s3340_s25, 4  ;;  %s44_s23 = int_to_ptr.vmem [resolvable:$true] %s43_s23  ;;  %s56_s26 = int_to_ptr.vmem [resolvable:$true] %s55_s26 }
  0x26   :  { %s3261_s29 = scalar_lea.hbm %s3830_s2, 128 }
  0x27   :  { %p3262_p2 = scmp.ne.s32.totalorder %s3830_s2, %s3261_s29  ;;  %p3265_p3 = scmp.lt.u32.totalorder %s3261_s29, %s3830_s2 }
  0x29   :  { %p3267_p4 = pnand %p3265_p3, %p3262_p2 }
  0x2b   :  { %3270 = shalt.err (!%p3267_p4)
}
  0x2c   :  { %s3271_s0 = scalar_lea.vmem %s44_s23, 128  ;;  %p3276_p6 = scmp.lt.s32.totalorder %s44_s23, %s44_s23 }
  0x2d   :  { %p3272_p5 = scmp.ne.s32.totalorder %s44_s23, %s3271_s0  ;;  %p3277_p7 = scmp.lt.s32.totalorder %s3271_s0, %s3271_s0 }
  0x2f   :  { %p3278_p8 = por %p3277_p7, %p3276_p6 }
  0x31   :  { %p3279_p9 = pnand %p3278_p8, %p3272_p5 }
  0x33   :  { %3282 = shalt.err (!%p3279_p9)
}
  0x34   :  { %46 = dma.hbm_to_vmem [thread:$0]  %s3830_s2, 128, %s44_s23, [#allocation6]  }
  0x35   :  { %s3283_s13 = scalar_lea.hbm %s3832_s4, 128 }
  0x36   :  { %p3284_p10 = scmp.ne.s32.totalorder %s3832_s4, %s3283_s13  ;;  %p3287_p11 = scmp.lt.u32.totalorder %s3283_s13, %s3832_s4 }
  0x38   :  { %p3289_p12 = pnand %p3287_p11, %p3284_p10 }
  0x3a   :  { %3292 = shalt.err (!%p3289_p12)
}
  0x3b   :  { %s3293_s18 = scalar_lea.vmem %s56_s26, 128  ;;  %p3298_p0 = scmp.lt.s32.totalorder %s56_s26, %s56_s26 }
  0x3c   :  { %p3294_p13 = scmp.ne.s32.totalorder %s56_s26, %s3293_s18  ;;  %p3299_p1 = scmp.lt.s32.totalorder %s3293_s18, %s3293_s18 }
  0x3e   :  { %p3300_p2 = por %p3299_p1, %p3298_p0 }
  0x40   :  { %p3301_p3 = pnand %p3300_p2, %p3294_p13 }
  0x42   :  { %3304 = shalt.err (!%p3301_p3)
}
  0x43   :  { %58 = dma.hbm_to_vmem [thread:$0]  %s3832_s4, 128, %s56_s26, [#allocation9]  }
  0x44   :  { %3327 = dma.done.wait [#allocation3], 256  }
  0x45   :  { %3328 = vsyncadd [#allocation3], 4294967040 }
  0x46   :  { %3329 = dma.done.wait [#allocation6], 256  }
  0x47   :  { %3330 = vsyncadd [#allocation6], 4294967040 }
  0x48   :  { %3331 = dma.done.wait [#allocation9], 128  }
  0x49   :  { %3332 = vsyncadd [#allocation9], 4294967168  ;;  %v3447_v0 = vld [vmem:[#allocation2] sm:$0xff]  ;;  %s3341_s21 = smov 64   ;;  %v3451_v1 = vld [vmem:[#allocation2 + $0x8] sm:$0xff]  ;;  %vm92_vm0 = vcmask 1048064   ;;  %v75_v15 = vlaneseq }
  0x4a   :  { %93 = vrot.lane.b32.xlu0 %v3447_v0, %s3341_s21  ;;  %v3342_v6 = vmov 0.0|0.0   ;;  %s3343_s4 = smov 65   ;;  %vm3344_vm1 = vmmov 0   ;;  %v3345_v10 = vmov 0.0   ;;  %s3346_s22 = smov 127   ;;  %v3478_v12 = vld [vmem:[%s3833_s5] sm:$0xff] }
  0x4b   :  { %3017 = vmatprep.subr.bf16.mxu1 %v3342_v6  ;;  %3023 = vmatprep.subr.bf16.mxu0 %v3342_v6  ;;  %v3347_v13 = vmov 0   ;;  %v3348_v14 = vmov 1   ;;  %v76_v16 = vand.u32 127, %v75_v15  ;;  %v117_v17 = vld [vmem:[#allocation5] sm:$0xff]  ;;  %vm118_vm2 = vcmask 261120   ;;  %v629_v24 = vld [vmem:[#allocation7] sm:$0xff] }
  0x4c   :  { %2743 = vmatprep.mubr.msk.f32.mxu1 %vm3344_vm1, %v3345_v10  ;;  %2754 = vmatprep.mubr.msk.f32.mxu0 %vm3344_vm1, %v3345_v10  ;;  %v120_v19 = vsel %vm118_vm2, %v117_v17, 0  ;;  %v129_v22 = vand.u32 4294901760, %v3447_v0  ;;  %v132_v23 = vand.u32 4294901760, %v3451_v1  ;;  %v631_v29 = vsel %vm118_vm2, %v629_v24, 0 }
  0x4d   :  { %3210 = vset.pattern.permute.xlu0 %v3347_v13  ;;  %3211 = vset.pattern.permute.xlu1 %v3348_v14  ;;  %v81_v18 = vand.u32 15, %v76_v16  ;;  %v3482_v20 = vand.u32 4294901760, %v120_v19  ;;  %v3510_v38 = vand.u32 4294901760, %v631_v29  ;;  %vm1122_vm5 = vcmask 130048  }
  0x4e   :  { %96 = vrot.lane.b32.xlu0 %v3451_v1, %s3341_s21  ;;  %v3496_v30 = vsub.f32 %v3447_v0, %v129_v22  ;;  %v3499_v31 = vsub.f32 %v3451_v1, %v132_v23  ;;  %v3529_v50 = vpack.c.bf16 %v132_v23, %v129_v22  ;;  %vm1607_vm6 = vcmask 195584  }
  0x4f   :  { %vm3484_vm3 = vcmp.gt.s32.totalorder %v81_v18, 0  ;;  %v3493_v27 = vsub.f32 %v120_v19, %v3482_v20  ;;  %vm3503_vm4 = vcmp.lt.s32.totalorder %v81_v18, 15  ;;  %v3527_v49 = vsub.f32 %v631_v29, %v3510_v38 }
  0x50   :  { %v218_v42 = vand.u32 4294901760, %v3496_v30  ;;  %v225_v43 = vand.u32 4294901760, %v3499_v31  ;;  %v3584_v17 = vpack.c.bf16 %v3499_v31, %v3496_v30  ;;  %vm2095_vm7 = vcmask 523264  }
  0x51   :  { %v193_v37 = vand.u32 4294901760, %v3493_v27  ;;  %v704_v60 = vand.u32 4294901760, %v3527_v49 }
  0x52   :  { %v219_v55 = vsub.f32 %v3496_v30, %v218_v42  ;;  %v226_v56 = vsub.f32 %v3499_v31, %v225_v43  ;;  %v3045_v23 = vpack.c.bf16 %v225_v43, %v218_v42 }
  0x53   :  { %v194_v48 = vsub.f32 %v3493_v27, %v193_v37 }
  0x55   :  { %v195_v58 = vand.u32 4294901760, %v194_v48 }
  0xbc   :  { %v94_v2 = vpop.permute.xlu0 %93 }
  0xbd   :  { %v95_v3 = vsel %vm92_vm0, %v94_v2, %v3447_v0 }
  0xbe   :  { %99 = vrot.lane.b32.xlu1 %v95_v3, %s3341_s21 }
  0xc0   :  { %v97_v4 = vpop.permute.xlu0 %96 }
  0xc1   :  { %v98_v5 = vsel %vm92_vm0, %v97_v4, %v3451_v1  ;;  %v705_v4 = vsub.f32 %v3527_v49, %v704_v60 }
  0xc2   :  { %101 = vrot.lane.b32.xlu1 %v98_v5, %s3341_s21 }
 0x130   :  { %v100_v7 = vpop.permute.xlu1 %99 }
 0x131   :  { %v103_v8 = vsel %vm92_vm0, %v100_v7, %v3447_v0  ;;  %v220_v0 = vand.u32 4294901760, %v219_v55 }
 0x132   :  { %109 = vrot.lane.b32.xlu0 %v103_v8, %s3343_s4 }
 0x134   :  { %v102_v9 = vpop.permute.xlu1 %101 }
 0x135   :  { %v104_v11 = vsel %vm92_vm0, %v102_v9, %v3451_v1  ;;  %v227_v1 = vand.u32 4294901760, %v226_v56 }
 0x136   :  { %621 = vrot.lane.b32.xlu0 %v103_v8, %s3346_s22  ;;  %111 = vrot.lane.b32.xlu1 %v104_v11, %s3343_s4 }
 0x137   :  { %v3562_v7 = vpack.c.bf16 %v227_v1, %v220_v0  ;;  %v2108_v1 = vld [vmem:[%s3831_s3] sm:$0xff]  ;;  %s3353_s3 = smov [#allocation10]  }
 0x138   :  { %s2595_s27 = sshll.u32 %s3353_s3, 4  ;;  %s2596_s27 = int_to_ptr.vmem [resolvable:$true] %s2595_s27 }
 0x139   :  { %s3305_s28 = scalar_lea.vmem %s2596_s27, 256  ;;  %p3310_p5 = scmp.lt.s32.totalorder %s2596_s27, %s2596_s27 }
 0x13a   :  { %623 = vrot.lane.b32.xlu1 %v104_v11, %s3346_s22  ;;  %609 = vperm.xlu0 %3210, %v3478_v12   ;;  %v706_v11 = vand.u32 4294901760, %v705_v4  ;;  %v2110_v4 = vsel %vm1607_vm6, %v2108_v1, 0  ;;  %p3306_p4 = scmp.ne.s32.totalorder %s2596_s27, %s3305_s28  ;;  %p3311_p6 = scmp.lt.s32.totalorder %s3305_s28, %s3305_s28 }
 0x13c   :  { %p3312_p7 = por %p3311_p6, %p3310_p5 }
 0x13e   :  { %614 = vperm.xlu1 %3211, %v3478_v12   ;;  %p3313_p8 = pnand %p3312_p7, %p3306_p4 }
 0x1a4   :  { %v110_v25 = vpop.permute.xlu0 %109 }
 0x1a5   :  { %v115_v26 = vsel %vm3484_vm3, %v110_v25, 0.0 }
 0x1a6   :  { %v123_v28 = vand.u32 4294901760, %v115_v26 }
 0x1a8   :  { %v3501_v32 = vsub.f32 %v115_v26, %v123_v28  ;;  %v112_v33 = vpop.permute.xlu1 %111  ;;  %v622_v35 = vpop.permute.xlu0 %621 }
 0x1a9   :  { %v116_v36 = vsel %vm3484_vm3, %v112_v33, 0.0  ;;  %v627_v40 = vsel %vm3503_vm4, %v622_v35, 0.0 }
 0x1aa   :  { %v126_v39 = vand.u32 4294901760, %v116_v36  ;;  %v204_v41 = vand.u32 4294901760, %v3501_v32  ;;  %v640_v51 = vand.u32 4294901760, %v627_v40 }
 0x1ac   :  { %v3517_v44 = vpack.c.bf16 %v126_v39, %v123_v28  ;;  %v3519_v45 = vsub.f32 %v116_v36, %v126_v39  ;;  %v624_v46 = vpop.permute.xlu1 %623  ;;  %v205_v53 = vsub.f32 %v3501_v32, %v204_v41  ;;  %v3549_v61 = vsub.f32 %v627_v40, %v640_v51 }
 0x1ad   :  { %v628_v47 = vsel %vm3503_vm4, %v624_v46, 0.0 }
 0x1ae   :  { %v643_v52 = vand.u32 4294901760, %v628_v47  ;;  %3019 = vmatpush3.bf16.msra.mxu1 %v3517_v44  ;;  %v211_v54 = vand.u32 4294901760, %v3519_v45  ;;  %v206_v62 = vand.u32 4294901760, %v205_v53  ;;  %v729_v5 = vand.u32 4294901760, %v3549_v61 }
 0x1af   :  { %3020 = vmatprep.subr.bf16.mxu1 %v3342_v6  ;;  %v3030_v15 = vpack.c.bf16 %v3519_v45, %v3501_v32 }
 0x1b0   :  { %v3543_v57 = vsub.f32 %v628_v47, %v643_v52  ;;  %v212_v59 = vsub.f32 %v3519_v45, %v211_v54  ;;  %v3564_v8 = vpack.c.bf16 %v643_v52, %v640_v51  ;;  %v730_v13 = vsub.f32 %v3549_v61, %v729_v5 }
 0x1b1   :  { %v3042_v22 = vpack.c.bf16 %v211_v54, %v204_v41 }
 0x1b2   :  { %3022 = vmatpush3.bf16.msra.mxu1 %v3529_v50  ;;  %v213_v63 = vand.u32 4294901760, %v212_v59  ;;  %v736_v2 = vand.u32 4294901760, %v3543_v57  ;;  %v731_v16 = vand.u32 4294901760, %v730_v13  ;;  %v3069_v19 = vpack.c.bf16 %v3543_v57, %v3549_v61 }
 0x1b3   :  { %3053 = vmatprep.subr.bf16.mxu1 %v3342_v6  ;;  %v3349_v59 = vmov 4  }
 0x1b4   :  { %v3024_v3 = vpack.c.bf16 %v213_v63, %v206_v62  ;;  %v737_v9 = vsub.f32 %v3543_v57, %v736_v2  ;;  %v3081_v24 = vpack.c.bf16 %v736_v2, %v729_v5  ;;  %3212 = vset.pattern.permute.xlu1 %v3349_v59  ;;  %v3351_v62 = vmov 5  }
 0x1b5   :  { %2744 = vmatmul.mubr.f32.vlgmr.msra.gmra.mrb[0].mxu1 %v195_v58  ;;  %v3352_v63 = vmov 3   ;;  %v3712_v5 = vand.u32 4294901760, %v2110_v4 }
 0x1b6   :  { %3055 = vmatpush3.bf16.msra.mxu1 %v3529_v50  ;;  %2809 = vmatprep.mubr.msk.f32.mxu1 %vm3344_vm1, %v3345_v10  ;;  %v738_v14 = vand.u32 4294901760, %v737_v9 }
 0x1b7   :  { %3025 = vmatpush3.bf16.msra.mxu0 %v3024_v3  ;;  %3056 = vmatprep.subr.bf16.mxu1 %v3342_v6 }
 0x1b8   :  { %3026 = vmatprep.subr.bf16.mxu0 %v3342_v6  ;;  %v3063_v18 = vpack.c.bf16 %v738_v14, %v731_v16 }
 0x1b9   :  { %v610_v32 = vpop.permute.xlu0 %609 }
 0x1ba   :  { %3058 = vmatpush3.bf16.msra.mxu1 %v3564_v8 }
 0x1bb   :  { %3028 = vmatpush3.bf16.msra.mxu0 %v3562_v7  ;;  %3059 = vmatprep.subr.bf16.mxu1 %v3342_v6 }
 0x1bc   :  { %3029 = vmatprep.subr.bf16.mxu0 %v3342_v6 }
 0x1bd   :  { %2810 = vmatmul.mubr.f32.vlgmr.msra.gmra.mrb[2].mxu1 %v706_v11  ;;  %v615_v36 = vpop.permute.xlu1 %614 }
 0x1be   :  { %2755 = vmatmul.mubr.f32.vlgmr.msra.gmra.mrb[0].mxu0 %v3482_v20  ;;  %3061 = vmatpush3.bf16.msra.mxu1 %v3562_v7 }
 0x1bf   :  { %3031 = vmatpush3.bf16.msra.mxu0 %v3030_v15  ;;  %3062 = vmatprep.subr.bf16.mxu1 %v3342_v6 }
 0x1c0   :  { %3032 = vmatprep.subr.bf16.mxu0 %v3342_v6  ;;  %2765 = vmatprep.mubr.msk.f32.mxu0 %vm3344_vm1, %v3345_v10 }
 0x1c1   :  { %2820 = vmatprep.mubr.msk.f32.mxu1 %vm3344_vm1, %v3345_v10 }
 0x1c2   :  { %3064 = vmatpush3.bf16.msra.mxu1 %v3063_v18 }
 0x1c3   :  { %3034 = vmatpush3.bf16.msra.mxu0 %v3584_v17  ;;  %3065 = vmatprep.subr.bf16.mxu1 %v3342_v6 }
 0x1c4   :  { %3035 = vmatprep.subr.bf16.mxu0 %v3342_v6 }
 0x1c5   :  { %2821 = vmatmul.mubr.f32.vlgmr.msra.gmra.mrb[2].mxu1 %v3510_v38 }
 0x1c6   :  { %2766 = vmatmul.mubr.f32.vlgmr.msra.gmra.mrb[0].mxu0 %v3493_v27  ;;  %3067 = vmatpush3.bf16.msra.mxu1 %v3584_v17 }
 0x1c7   :  { %3037 = vmatpush3.bf16.msra.mxu0 %v3517_v44  ;;  %3068 = vmatprep.subr.bf16.mxu1 %v3342_v6 }
 0x1c8   :  { %3038 = vmatprep.subr.bf16.mxu0 %v3342_v6  ;;  %2776 = vmatprep.mubr.msk.f32.mxu0 %vm3344_vm1, %v3345_v10 }
 0x1c9   :  { %2831 = vmatprep.mubr.msk.f32.mxu1 %vm3344_vm1, %v3345_v10 }
 0x1ca   :  { %3070 = vmatpush3.bf16.msra.mxu1 %v3069_v19 }
 0x1cb   :  { %3040 = vmatpush3.bf16.msra.mxu0 %v3529_v50  ;;  %3071 = vmatprep.subr.bf16.mxu1 %v3342_v6 }
 0x1cc   :  { %3041 = vmatprep.subr.bf16.mxu0 %v3342_v6 }
 0x1cd   :  { %2832 = vmatmul.mubr.f32.vlgmr.msra.gmra.mrb[2].mxu1 %v3527_v49 }
 0x1ce   :  { %2777 = vmatmul.mubr.f32.vlgmr.msra.gmra.mrb[0].mxu0 %v193_v37  ;;  %3073 = vmatpush3.bf16.msra.mxu1 %v3529_v50 }
 0x1cf   :  { %3043 = vmatpush3.bf16.msra.mxu0 %v3042_v22  ;;  %3074 = vmatprep.subr.bf16.mxu1 %v3342_v6 }
 0x1d0   :  { %3044 = vmatprep.subr.bf16.mxu0 %v3342_v6  ;;  %2787 = vmatprep.mubr.msk.f32.mxu0 %vm3344_vm1, %v3345_v10 }
 0x1d1   :  { %2842 = vmatprep.mubr.msk.f32.mxu1 %vm3344_vm1, %v3345_v10 }
 0x1d2   :  { %3076 = vmatpush3.bf16.msra.mxu1 %v3564_v8 }
 0x1d3   :  { %3046 = vmatpush3.bf16.msra.mxu0 %v3045_v23  ;;  %3077 = vmatprep.subr.bf16.mxu1 %v3342_v6 }
 0x1d4   :  { %3047 = vmatprep.subr.bf16.mxu0 %v3342_v6 }
 0x1d5   :  { %2843 = vmatmul.mubr.f32.vlgmr.msra.gmra.mrb[2].mxu1 %v704_v60  ;;  %v3350_v60 = vmov 2  }
 0x1d6   :  { %2788 = vmatmul.mubr.f32.vlgmr.msra.gmra.mrb[0].mxu0 %v3482_v20  ;;  %3079 = vmatpush3.bf16.msra.mxu1 %v3045_v23 }
 0x1d7   :  { %3049 = vmatpush3.bf16.msra.mxu0 %v3517_v44  ;;  %3080 = vmatprep.subr.bf16.mxu1 %v3342_v6 }
 0x1d8   :  { %3050 = vmatprep.subr.bf16.mxu0 %v3342_v6  ;;  %2798 = vmatprep.mubr.msk.f32.mxu0 %vm3344_vm1, %v3345_v10 }
 0x1d9   :  { %2853 = vmatprep.mubr.msk.f32.mxu1 %vm3344_vm1, %v3345_v10  ;;  %3213 = vset.pattern.permute.xlu0 %v3350_v60 }
 0x1da   :  { %3082 = vmatpush3.bf16.msra.mxu1 %v3081_v24 }
 0x1db   :  { %3052 = vmatpush3.bf16.msra.mxu0 %v3529_v50  ;;  %3083 = vmatprep.subr.bf16.mxu1 %v3342_v6 }
 0x1dc   :  { %3092 = vmatprep.subr.bf16.mxu0 %v3342_v6 }
 0x1dd   :  { %2854 = vmatmul.mubr.f32.vlgmr.msra.gmra.mrb[2].mxu1 %v3510_v38 }
 0x1de   :  { %2799 = vmatmul.mubr.f32.vlgmr.msra.gmra.mrb[0].mxu0 %v3482_v20  ;;  %3085 = vmatpush3.bf16.msra.mxu1 %v3529_v50  ;;  %v1121_v20 = vld [vmem:[#allocation8] sm:$0xff] }
 0x1df   :  { %3086 = vmatprep.subr.bf16.mxu1 %v3342_v6  ;;  %2864 = vmatprep.mubr.msk.f32.mxu1 %vm3344_vm1, %v3345_v10  ;;  %v1124_v25 = vsel %vm1122_vm5, %v1121_v20, 0 }
 0x1e0   :  { %3094 = vmatpush3.bf16.msra.mxu0 %v3562_v7  ;;  %2878 = vmatprep.mubr.msk.f32.mxu0 %vm3344_vm1, %v3345_v10  ;;  %v1193_v26 = vand.u32 4294901760, %v1124_v25 }
 0x1e1   :  { %3095 = vmatprep.subr.bf16.mxu0 %v3342_v6 }
 0x1e2   :  { %3088 = vmatpush3.bf16.msra.mxu1 %v3564_v8  ;;  %v1194_v27 = vsub.f32 %v1124_v25, %v1193_v26  ;;  %v3718_v8 = vsub.f32 %v2110_v4, %v3712_v5 }
 0x1e3   :  { %3089 = vmatprep.subr.bf16.mxu1 %v3342_v6  ;;  %2879 = vmatmul.mubr.f32.vlgmr.msra.gmra.mrb[2].mxu0 %v1193_v26 }
 0x1e4   :  { %3097 = vmatpush3.bf16.msra.mxu0 %v3584_v17  ;;  %2885 = vmatprep.mubr.msk.f32.mxu0 %vm3344_vm1, %v3345_v10  ;;  %v1195_v28 = vand.u32 4294901760, %v1194_v27  ;;  %v3725_v11 = vand.u32 4294901760, %v3718_v8 }
 0x1e5   :  { %2865 = vmatmul.mubr.f32.vlgmr.msra.gmra.mrb[2].mxu1 %v3510_v38  ;;  %3098 = vmatprep.subr.bf16.mxu0 %v3342_v6 }
 0x1e6   :  { %3091 = vmatpush3.bf16.msra.mxu1 %v3529_v50  ;;  %2871 = vmatprep.mubr.msk.f32.mxu1 %vm3344_vm1, %v3345_v10  ;;  %v1196_v48 = vsub.f32 %v1194_v27, %v1195_v28  ;;  %v2183_v15 = vsub.f32 %v3718_v8, %v3725_v11 }
 0x1e7   :  { %3107 = vmatprep.subr.bf16.mxu1 %v3342_v6 }
 0x1e8   :  { %v1197_v49 = vand.u32 4294901760, %v1196_v48  ;;  %v2184_v22 = vand.u32 4294901760, %v2183_v15 }
 0x1ea   :  { %2872 = vmatmul.mubr.f32.vlgmr.msra.gmra.mrb[4].mxu1 %v1197_v49 }
 0x1eb   :  { %2886 = vmatmul.mubr.f32.vlgmr.msra.gmra.mrb[2].mxu0 %v1194_v27  ;;  %2915 = vmatprep.mubr.msk.f32.mxu1 %vm3344_vm1, %v3345_v10 }
 0x1ec   :  { %3100 = vmatpush3.bf16.msra.mxu0 %v3529_v50  ;;  %2892 = vmatprep.mubr.msk.f32.mxu0 %vm3344_vm1, %v3345_v10 }
 0x1ed   :  { %3101 = vmatprep.subr.bf16.mxu0 %v3342_v6 }
 0x1f3   :  { %2893 = vmatmul.mubr.f32.vlgmr.msra.gmra.mrb[2].mxu0 %v1195_v28 }
 0x1f4   :  { %3103 = vmatpush3.bf16.msra.mxu0 %v3045_v23  ;;  %2899 = vmatprep.mubr.msk.f32.mxu0 %vm3344_vm1, %v3345_v10 }
 0x1f5   :  { %3104 = vmatprep.subr.bf16.mxu0 %v3342_v6 }
 0x1fb   :  { %2900 = vmatmul.mubr.f32.vlgmr.msra.gmra.mrb[2].mxu0 %v1193_v26 }
 0x1fc   :  { %3106 = vmatpush3.bf16.msra.mxu0 %v3529_v50  ;;  %2906 = vmatprep.mubr.msk.f32.mxu0 %vm3344_vm1, %v3345_v10 }
 0x1fd   :  { %3125 = vmatprep.subr.bf16.mxu0 %v3342_v6 }
 0x203   :  { %2907 = vmatmul.mubr.f32.vlgmr.msra.gmra.mrb[2].mxu0 %v1193_v26 }
 0x204   :  { %2969 = vmatprep.mubr.msk.f32.mxu0 %vm3344_vm1, %v3345_v10 }
 0x288   :  { %v197_v29 = vpop.f32.mrb[0].mxu1 }
 0x289   :  { %v2745_v30 = vpop.f32.mrb[1].mxu1 }
 0x2b1   :  { %v603_v31 = vpop.f32.mrb[0].mxu0 }
 0x2b2   :  { %v3143_v33 = vadd.f32 %v603_v31, %v197_v29  ;;  %v2800_v35 = vpop.f32.mrb[1].mxu0 }
 0x2b4   :  { %v612_v37 = vmul.f32 %v3143_v33, %v610_v32 }
 0x2b6   :  { %v617_v38 = vadd.f32 %v615_v36, %v612_v37 }
 0x2b8   :  { %v618_v39 = vmax.f32 %v617_v38, 0.0  ;;  %v1114_v40 = vpop.f32.mrb[2].mxu1 }
 0x2b9   :  { %v1118_v41 = vmul.f32 %v1114_v40, %v610_v32  ;;  %v2866_v42 = vpop.f32.mrb[3].mxu1 }
 0x2ba   :  { %2097 = vrot.lane.b32.xlu0 %v618_v39, %s3341_s21  ;;  %v3685_v46 = vand.u32 4294901760, %v618_v39 }
 0x2bb   :  { %v1119_v43 = vadd.f32 %v1118_v41, %v615_v36 }
 0x2bd   :  { %v1120_v44 = vmax.f32 %v1119_v43, 0.0  ;;  %v1199_v0 = vpop.f32.mrb[4].mxu1 }
 0x2be   :  { %v2873_v3 = vpop.f32.mrb[5].mxu1 }
 0x2bf   :  { %v3682_v45 = vand.u32 4294901760, %v1120_v44  ;;  %1595 = vrot.lane.b32.xlu1 %v1120_v44, %s3341_s21 }
 0x2c1   :  { %v3689_v47 = vpack.c.bf16 %v3682_v45, %v3685_v46  ;;  %v3715_v7 = vsub.f32 %v1120_v44, %v3682_v45 }
 0x2c3   :  { %3127 = vmatpush3.bf16.msra.mxu0 %v3689_v47  ;;  %v3722_v9 = vand.u32 4294901760, %v3715_v7 }
 0x2c4   :  { %2967 = vmatprep.subr.mxu0 %v3345_v10 }
 0x2c5   :  { %v1707_v14 = vsub.f32 %v3715_v7, %v3722_v9 }
 0x2c7   :  { %v1708_v18 = vand.u32 4294901760, %v1707_v14 }
 0x2d6   :  { %v1581_v58 = vpop.f32.mrb[2].mxu0 }
 0x2d7   :  { %v2908_v61 = vpop.f32.mrb[3].mxu0  ;;  %v3710_v2 = vadd.f32 %v1581_v58, %v1199_v0 }
 0x32c   :  { %v2098_v50 = vpop.permute.xlu0 %2097 }
 0x32d   :  { %v2099_v51 = vsel %vm92_vm0, %v2098_v50, %v618_v39 }
 0x32e   :  { %2100 = vrot.lane.b32.xlu0 %v2099_v51, %s3341_s21 }
 0x331   :  { %v1596_v52 = vpop.permute.xlu1 %1595 }
 0x332   :  { %v1597_v53 = vsel %vm92_vm0, %v1596_v52, %v1120_v44 }
 0x333   :  { %1598 = vrot.lane.b32.xlu1 %v1597_v53, %s3341_s21 }
 0x3a0   :  { %v2101_v54 = vpop.permute.xlu0 %2100 }
 0x3a1   :  { %v2102_v55 = vsel %vm92_vm0, %v2101_v54, %v618_v39 }
 0x3a2   :  { %2104 = vrot.lane.b32.xlu0 %v2102_v55, %s3346_s22 }
 0x3a5   :  { %v1599_v56 = vpop.permute.xlu1 %1598 }
 0x3a6   :  { %v1600_v57 = vsel %vm92_vm0, %v1599_v56, %v1120_v44  ;;  %2084 = vperm.xlu0 %3213, %v3478_v12  }
 0x3a7   :  { %1602 = vrot.lane.b32.xlu1 %v1600_v57, %s3343_s4 }
 0x3aa   :  { %3216 = vset.pattern.permute.xlu0 %v3352_v63 }
 0x3ab   :  { %1586 = vperm.xlu1 %3212, %v3478_v12  }
 0x3af   :  { %3214 = vset.pattern.permute.xlu1 %v3351_v62 }
 0x3b0   :  { %1591 = vperm.xlu1 %3214, %v3478_v12  }
 0x3b4   :  { %3215 = vset.pattern.permute.xlu1 %v3352_v63 }
 0x3b5   :  { %2089 = vperm.xlu1 %3215, %v3478_v12   ;;  %v1698_v12 = vsub.f32 %v618_v39, %v3685_v46 }
 0x3b7   :  { %v3727_v13 = vand.u32 4294901760, %v1698_v12  ;;  %v3132_v21 = vpack.c.bf16 %v3715_v7, %v1698_v12 }
 0x3b9   :  { %v1700_v16 = vsub.f32 %v1698_v12, %v3727_v13  ;;  %v3138_v39 = vpack.c.bf16 %v3722_v9, %v3727_v13 }
 0x3bb   :  { %v1701_v24 = vand.u32 4294901760, %v1700_v16 }
 0x3bd   :  { %v3129_v25 = vpack.c.bf16 %v1708_v18, %v1701_v24 }
 0x414   :  { %v2105_v17 = vpop.permute.xlu0 %2104 }
 0x415   :  { %v2107_v19 = vsel %vm3503_vm4, %v2105_v17, 0.0 }
 0x416   :  { %v3736_v23 = vand.u32 4294901760, %v2107_v19 }
 0x418   :  { %v2206_v20 = vsub.f32 %v2107_v19, %v3736_v23  ;;  %2968 = vmatpush3.msra.mxu0 %v3736_v23 }
 0x419   :  { %2970 = vmatmul.mubr.f32.vlgmr.msra.gmra.mrb[4].mxu0 %v2184_v22  ;;  %3128 = vmatprep.subr.bf16.mxu0 %v3342_v6  ;;  %v1603_v26 = vpop.permute.xlu1 %1602 }
 0x41a   :  { %v2207_v27 = vand.u32 4294901760, %v2206_v20  ;;  %v1605_v28 = vsel %vm3484_vm3, %v1603_v26, 0.0  ;;  %3130 = vmatpush3.bf16.msra.mxu0 %v3129_v25  ;;  %2978 = vmatprep.mubr.msk.f32.mxu0 %vm3344_vm1, %v3345_v10 }
 0x41b   :  { %v1612_v34 = vand.u32 4294901760, %v1605_v28  ;;  %2976 = vmatprep.subr.mxu0 %v3345_v10 }
 0x41c   :  { %v2208_v29 = vsub.f32 %v2206_v20, %v2207_v27 }
 0x41d   :  { %v3747_v30 = vpack.c.bf16 %v3685_v46, %v1612_v34  ;;  %v1691_v31 = vsub.f32 %v1605_v28, %v1612_v34 }
 0x41e   :  { %v2209_v32 = vand.u32 4294901760, %v2208_v29 }
 0x41f   :  { %v1692_v33 = vand.u32 4294901760, %v1691_v31  ;;  %3109 = vmatpush3.bf16.msra.mxu1 %v3747_v30  ;;  %v3114_v38 = vpack.c.bf16 %v1698_v12, %v1691_v31 }
 0x420   :  { %2977 = vmatpush3.msra.mxu0 %v2209_v32  ;;  %2913 = vmatprep.subr.mxu1 %v3345_v10 }
 0x421   :  { %v1693_v35 = vsub.f32 %v1691_v31, %v1692_v33  ;;  %2979 = vmatmul.mubr.f32.vlgmr.msra.gmra.mrb[4].mxu0 %v3712_v5  ;;  %3131 = vmatprep.subr.bf16.mxu0 %v3342_v6  ;;  %v3120_v40 = vpack.c.bf16 %v3727_v13, %v1692_v33 }
 0x422   :  { %3133 = vmatpush3.bf16.msra.mxu0 %v3132_v21  ;;  %2987 = vmatprep.mubr.msk.f32.mxu0 %vm3344_vm1, %v3345_v10 }
 0x423   :  { %v1694_v36 = vand.u32 4294901760, %v1693_v35  ;;  %2914 = vmatpush3.msra.mxu1 %v3682_v45  ;;  %2985 = vmatprep.subr.mxu0 %v3345_v10 }
 0x424   :  { %2916 = vmatmul.mubr.f32.vlgmr.msra.gmra.mrb[6].mxu1 %v2184_v22  ;;  %3110 = vmatprep.subr.bf16.mxu1 %v3342_v6 }
 0x425   :  { %v3111_v37 = vpack.c.bf16 %v1701_v24, %v1694_v36  ;;  %2924 = vmatprep.mubr.msk.f32.mxu1 %vm3344_vm1, %v3345_v10  ;;  %v2085_v43 = vpop.permute.xlu0 %2084 }
 0x426   :  { %2986 = vmatpush3.msra.mxu0 %v2206_v20 }
 0x427   :  { %3112 = vmatpush3.bf16.msra.mxu1 %v3111_v37  ;;  %3134 = vmatprep.subr.bf16.mxu0 %v3342_v6 }
 0x428   :  { %2922 = vmatprep.subr.mxu1 %v3345_v10 }
 0x429   :  { %2988 = vmatmul.mubr.f32.vlgmr.msra.gmra.mrb[4].mxu0 %v3718_v8 }
 0x42a   :  { %3136 = vmatpush3.bf16.msra.mxu0 %v3689_v47  ;;  %2996 = vmatprep.mubr.msk.f32.mxu0 %vm3344_vm1, %v3345_v10  ;;  %v1587_v41 = vpop.permute.xlu1 %1586 }
 0x42b   :  { %2923 = vmatpush3.msra.mxu1 %v1708_v18  ;;  %2994 = vmatprep.subr.mxu0 %v3345_v10  ;;  %v1589_v44 = vmul.f32 %v3710_v2, %v1587_v41 }
 0x42c   :  { %2925 = vmatmul.mubr.f32.vlgmr.msra.gmra.mrb[6].mxu1 %v3712_v5  ;;  %3113 = vmatprep.subr.bf16.mxu1 %v3342_v6 }
 0x42d   :  { %3115 = vmatpush3.bf16.msra.mxu1 %v3114_v38  ;;  %2933 = vmatprep.mubr.msk.f32.mxu1 %vm3344_vm1, %v3345_v10 }
 0x42e   :  { %2995 = vmatpush3.msra.mxu0 %v3736_v23  ;;  %2931 = vmatprep.subr.mxu1 %v3345_v10 }
 0x42f   :  { %3137 = vmatprep.subr.bf16.mxu0 %v3342_v6  ;;  %v1592_v42 = vpop.permute.xlu1 %1591 }
 0x430   :  { %v1594_v49 = vadd.f32 %v1592_v42, %v1589_v44 }
 0x431   :  { %2997 = vmatmul.mubr.f32.vlgmr.msra.gmra.mrb[4].mxu0 %v3725_v11  ;;  %2932 = vmatpush3.msra.mxu1 %v3715_v7 }
 0x432   :  { %3139 = vmatpush3.bf16.msra.mxu0 %v3138_v39  ;;  %3116 = vmatprep.subr.bf16.mxu1 %v3342_v6 }
 0x433   :  { %3003 = vmatprep.subr.mxu0 %v3345_v10  ;;  %3005 = vmatprep.mubr.msk.f32.mxu0 %vm3344_vm1, %v3345_v10 }
 0x434   :  { %2934 = vmatmul.mubr.f32.vlgmr.msra.gmra.mrb[6].mxu1 %v3718_v8 }
 0x435   :  { %3118 = vmatpush3.bf16.msra.mxu1 %v3747_v30  ;;  %2942 = vmatprep.mubr.msk.f32.mxu1 %vm3344_vm1, %v3345_v10 }
 0x436   :  { %3004 = vmatpush3.msra.mxu0 %v2207_v27  ;;  %2940 = vmatprep.subr.mxu1 %v3345_v10 }
 0x437   :  { %3140 = vmatprep.subr.bf16.mxu0 %v3342_v6 }
 0x439   :  { %2941 = vmatpush3.msra.mxu1 %v3682_v45  ;;  %3006 = vmatmul.mubr.f32.vlgmr.msra.gmra.mrb[4].mxu0 %v3712_v5 }
 0x43a   :  { %3142 = vmatpush3.bf16.msra.mxu0 %v3689_v47  ;;  %3119 = vmatprep.subr.bf16.mxu1 %v3342_v6 }
 0x43b   :  { %3012 = vmatprep.subr.mxu0 %v3345_v10  ;;  %3014 = vmatprep.mubr.msk.f32.mxu0 %vm3344_vm1, %v3345_v10 }
 0x43c   :  { %2943 = vmatmul.mubr.f32.vlgmr.msra.gmra.mrb[6].mxu1 %v3725_v11 }
 0x43d   :  { %3121 = vmatpush3.bf16.msra.mxu1 %v3120_v40  ;;  %2951 = vmatprep.mubr.msk.f32.mxu1 %vm3344_vm1, %v3345_v10 }
 0x43e   :  { %3013 = vmatpush3.msra.mxu0 %v3736_v23  ;;  %2949 = vmatprep.subr.mxu1 %v3345_v10 }
 0x441   :  { %2950 = vmatpush3.msra.mxu1 %v3722_v9  ;;  %3015 = vmatmul.mubr.f32.vlgmr.msra.gmra.mrb[4].mxu0 %v3712_v5 }
 0x442   :  { %3122 = vmatprep.subr.bf16.mxu1 %v3342_v6  ;;  %v2090_v6 = vpop.permute.xlu1 %2089 }
 0x444   :  { %2952 = vmatmul.mubr.f32.vlgmr.msra.gmra.mrb[6].mxu1 %v3712_v5 }
 0x445   :  { %3124 = vmatpush3.bf16.msra.mxu1 %v3747_v30  ;;  %2960 = vmatprep.mubr.msk.f32.mxu1 %vm3344_vm1, %v3345_v10 }
 0x446   :  { %2958 = vmatprep.subr.mxu1 %v3345_v10 }
 0x449   :  { %2959 = vmatpush3.msra.mxu1 %v3682_v45 }
 0x44c   :  { %2961 = vmatmul.mubr.f32.vlgmr.msra.gmra.mrb[6].mxu1 %v3712_v5 }
 0x514   :  { %v2580_v46 = vpop.f32.mrb[4].mxu0 }
 0x515   :  { %v2584_v47 = vmul.f32 %v2580_v46, %v2085_v43  ;;  %v3016_v48 = vpop.f32.mrb[5].mxu0 }
 0x517   :  { %v2585_v50 = vadd.f32 %v2584_v47, %v2090_v6 }
 0x519   :  { %v2586_v51 = vadd.f32 %v2585_v50, %v1594_v49 }
 0x51b   :  { %v2587_v52 = vmax.f32 %v2586_v51, 0.0 }
 0x51d   :  { %2589 = vst.msk [vmem:[#allocation10 + $0x8] sm:$0xff] %vm2095_vm7, %v2587_v52 }
 0x51f   :  { %v2079_v10 = vpop.f32.mrb[6].mxu1 }
 0x520   :  { %v2087_v53 = vmul.f32 %v2085_v43, %v2079_v10  ;;  %v2962_v45 = vpop.f32.mrb[7].mxu1 }
 0x522   :  { %v2092_v54 = vadd.f32 %v2090_v6, %v2087_v53 }
 0x524   :  { %v2093_v55 = vadd.f32 %v2092_v54, %v1594_v49 }
 0x526   :  { %v2094_v56 = vmax.f32 %v2093_v55, 0.0 }
 0x528   :  { %2096 = vst.msk [vmem:[#allocation10] sm:$0xff] %vm2095_vm7, %v2094_v56 }
 0x529   :  { %3316 = shalt.err (!%p3313_p8)
}
 0x52a   :  { %s3317_s7 = scalar_lea.hbm %s3834_s6, 256 }
 0x52b   :  { %p3318_p9 = scmp.ne.s32.totalorder %s3834_s6, %s3317_s7  ;;  %p3321_p10 = scmp.lt.u32.totalorder %s3317_s7, %s3834_s6 }
 0x52d   :  { %p3323_p11 = pnand %p3321_p10, %p3318_p9 }
 0x52f   :  { %3326 = shalt.err (!%p3323_p11)
}
 0x530   :  { %2601 = dma.vmem_to_hbm [thread:$0]  %s2596_s27, 256, %s3834_s6, [#allocation4], %s3337_s1, %s3337_s1, %s3338_s19  }
 0x531   :  { %3333 = dma.done.wait [#allocation4], 256  }
 0x532   :  { %3334 = vsyncadd [#allocation4], 4294967040 }
 0x533   :  { %2605 = vsyncpa [#allocation3], 1 }
 0x534   :  { %2606 = vsyncpa [#allocation6], 1 }
 0x535   :  { %2607 = vsyncpa [#allocation9], 1 }
 0x536   :  { %2608 = vsyncpa [#allocation4], 1 }

</bundles_post_ra>
